<compile_context>
chip_gen: v6e
topology: v6e:2x2x1
jax: 0.10.0
libtpu: 0.0.40
codegen_flags: <defaults>
</compile_context>

<pallas_src>
import functools

import jax
import jax.numpy as jnp
from jax.experimental import pallas as pl
from jax.experimental.pallas import tpu as pltpu


# ----------------------------------------------------------------------------
# Kernel 1: Conv2d (+bias) + ReLU, lane-dense transposed output, with fused
#           per-batch BN partial statistics accumulated over the HW-tile axis.
# ----------------------------------------------------------------------------
def _conv_relu_stats_kernel(w_ref, b_ref, p_ref, y_ref, sum_ref, sq_ref, *,
                            hw, tile_hw, masked):
    # w_ref:   (C_out, K)        im2col-ordered weights (K = kh*kw*C_in)
    # b_ref:   (C_out, 1)        bias
    # p_ref:   (K, tile_hw)      im2col patch slab (lane-dense HW tile)
    # y_ref:   (C_out, tile_hw)  conv+ReLU output (NCHW-ordered)
    # sum_ref: (C_out, 1)        per-batch running sum       (accum over j)
    # sq_ref:  (C_out, 1)        per-batch running sum of squares
    j = pl.program_id(1)

    # One MXU dot over the full contraction dim, f32 accumulation.
    acc = jnp.dot(w_ref[...], p_ref[...], preferred_element_type=jnp.float32)
    y = jnp.maximum(acc + b_ref[...], 0.0)          # bias + ReLU
    y_ref[...] = y.astype(y_ref.dtype)

    if masked:
        # Zero-padded HW columns must not pollute the BN statistics.
        col = jax.lax.broadcasted_iota(jnp.int32, y.shape, 1) + j * tile_hw
        y = jnp.where(col < hw, y, 0.0)

    @pl.when(j == 0)
    def _init():
        sum_ref[...] = jnp.zeros_like(sum_ref)
        sq_ref[...] = jnp.zeros_like(sq_ref)

    sum_ref[...] += jnp.sum(y, axis=-1, keepdims=True)
    sq_ref[...] += jnp.sum(y * y, axis=-1, keepdims=True)


# ----------------------------------------------------------------------------
# Kernel 2: BatchNorm normalization with folded affine: y * scale + shift.
#           Per-channel scale/shift broadcast along dense lanes.
# ----------------------------------------------------------------------------
def _bn_affine_kernel(y_ref, scale_ref, shift_ref, o_ref):
    o_ref[...] = (y_ref[...].astype(jnp.float32) * scale_ref[...]
                  + shift_ref[...]).astype(o_ref.dtype)


def _round_up(x, m):
    return ((x + m - 1) // m) * m


# ----------------------------------------------------------------------------
# Wrapper: Conv2dBlock forward.
# ----------------------------------------------------------------------------
def conv2d_block_forward(x, w, b, gamma, beta, *, stride=(1, 1),
                         dilation=(1, 1), eps=1e-5, max_tile_hw=512):
    """x: (N, C_in, H, W) float32 (NCHW).  Returns (N, C_out, H_out, W_out)."""
    n, c_in, _, _ = x.shape
    c_out, c_in_w, kh, kw = w.shape
    assert c_in_w == c_in
    sh, sw = stride
    dh, dw = dilation

    # SpeechBrain 'same' padding amounts (reflect mode, odd kernels).
    def _pad_amt(k, s, d):
        return k // 2 if s > 1 else (d * (k - 1)) // 2

    ph, pw = _pad_amt(kh, sh, dh), _pad_amt(kw, sw, dw)
    x_p = jnp.pad(x, ((0, 0), (0, 0), (ph, ph), (pw, pw)),
                  mode="reflect").astype(jnp.float32)
    h_p, w_p = x_p.shape[2], x_p.shape[3]
    h_out = (h_p - dh * (kh - 1) - 1) // sh + 1
    w_out = (w_p - dw * (kw - 1) - 1) // sw + 1
    hw = h_out * w_out
    k_dim = kh * kw * c_in

    # im2col built in the wrapper (small C_in): patch[n, (i*kw+j)*C_in + c, p]
    #   = x_p[n, c, i*dh + (p // w_out)*sh, j*dw + (p % w_out)*sw]
    taps = []
    for i in range(kh):
        for j in range(kw):
            hs, ws = i * dh, j * dw
            taps.append(x_p[:, :, hs:hs + sh * (h_out - 1) + 1:sh,
                                  ws:ws + sw * (w_out - 1) + 1:sw])
    patch = jnp.stack(taps, axis=1).reshape(n, k_dim, hw)

    # Lane-dense tiling of the HW (time) axis.
    tile_hw = min(max_tile_hw, _round_up(hw, 128))
    hw_p = _round_up(hw, tile_hw)
    n_t = hw_p // tile_hw
    if hw_p != hw:
        patch = jnp.pad(patch, ((0, 0), (0, 0), (0, hw_p - hw)))

    # im2col-ordered weights: (C_out, K), K index = (i*kw + j)*C_in + c.
    w_k = jnp.transpose(w, (0, 2, 3, 1)).reshape(c_out, k_dim).astype(jnp.float32)
    b_k = b.reshape(c_out, 1).astype(jnp.float32)

    kernel1 = functools.partial(_conv_relu_stats_kernel, hw=hw,
                                tile_hw=tile_hw, masked=(hw_p != hw))

    # Pass 1: Conv + bias + ReLU with fused per-batch BN partial statistics.
    y, psum, psq = pl.pallas_call(
        kernel1,
        out_shape=(jax.ShapeDtypeStruct((n, c_out, hw_p), jnp.float32),
                   jax.ShapeDtypeStruct((n, c_out, 1), jnp.float32),
                   jax.ShapeDtypeStruct((n, c_out, 1), jnp.float32)),
        grid=(n, n_t),
        in_specs=[
            pl.BlockSpec((c_out, k_dim), lambda i, j: (0, 0)),
            pl.BlockSpec((c_out, 1), lambda i, j: (0, 0)),
            pl.BlockSpec((None, k_dim, tile_hw), lambda i, j: (i, 0, j)),
        ],
        out_specs=(
            pl.BlockSpec((None, c_out, tile_hw), lambda i, j: (i, 0, j)),
            pl.BlockSpec((None, c_out, 1), lambda i, j: (i, 0, 0)),
            pl.BlockSpec((None, c_out, 1), lambda i, j: (i, 0, 0)),
        ),
        compiler_params=pltpu.CompilerParams(
            dimension_semantics=("parallel", "arbitrary"),
            vmem_limit_bytes=64 * 1024 * 1024),
    )(w_k, b_k, patch)

    # Training-mode BatchNorm2d statistics (biased variance), reduced in f32.
    count = float(n * hw)
    mean = jnp.sum(psum, axis=0) / count                          # (C_out, 1)
    var = jnp.maximum(jnp.sum(psq, axis=0) / count - mean * mean, 0.0)
    inv_std = jax.lax.rsqrt(var + eps)
    scale = gamma.reshape(c_out, 1).astype(jnp.float32) * inv_std
    shift = beta.reshape(c_out, 1).astype(jnp.float32) - mean * scale
    # TODO(synk): running_mean / running_var momentum buffer update is not
    # materialized; it does not affect the returned tensor in training mode.

    # Pass 2: normalize + affine (folded), aliased onto y's buffer, lane-dense.
    y_bn = pl.pallas_call(
        _bn_affine_kernel,
        out_shape=jax.ShapeDtypeStruct((n, c_out, hw_p), jnp.float32),
        grid=(n, n_t),
        in_specs=[
            pl.BlockSpec((None, c_out, tile_hw), lambda i, j: (i, 0, j)),
            pl.BlockSpec((c_out, 1), lambda i, j: (0, 0)),
            pl.BlockSpec((c_out, 1), lambda i, j: (0, 0)),
        ],
        out_specs=pl.BlockSpec((None, c_out, tile_hw), lambda i, j: (i, 0, j)),
        input_output_aliases={0: 0},
        compiler_params=pltpu.CompilerParams(
            dimension_semantics=("parallel", "parallel"),
            vmem_limit_bytes=64 * 1024 * 1024),
    )(y, scale, shift)

    # Already NCHW-ordered: drop HW padding and split H/W (free reshape).
    return y_bn[:, :, :hw].reshape(n, c_out, h_out, w_out)


# ----------------------------------------------------------------------------
# Pure-JAX reference for a sanity check.
# ----------------------------------------------------------------------------
def _reference(x, w, b, gamma, beta, stride, dilation, eps=1e-5):
    kh, kw = w.shape[2], w.shape[3]
    sh, sw = stride
    dh, dw = dilation
    ph = kh // 2 if sh > 1 else (dh * (kh - 1)) // 2
    pw = kw // 2 if sw > 1 else (dw * (kw - 1)) // 2
    x_p = jnp.pad(x, ((0, 0), (0, 0), (ph, ph), (pw, pw)), mode="reflect")
    y = jax.lax.conv_general_dilated(
        x_p, w, window_strides=stride, padding="VALID", rhs_dilation=dilation,
        dimension_numbers=("NCHW", "OIHW", "NCHW"),
        precision=jax.lax.Precision.HIGHEST)
    y = y + b[None, :, None, None]
    y = jnp.maximum(y, 0.0)
    mean = jnp.mean(y, axis=(0, 2, 3), keepdims=True)
    var = jnp.mean((y - mean) ** 2, axis=(0, 2, 3), keepdims=True)
    return ((y - mean) / jnp.sqrt(var + eps) * gamma[None, :, None, None]
            + beta[None, :, None, None])


if __name__ == "__main__":
    key = jax.random.PRNGKey(0)
    k_x, k_w, k_b, k_g, k_be = jax.random.split(key, 5)

    # Small shapes consistent with Conv2dBlock(4, 8, 3, stride=(2, 1)).
    N, C_in, H, W = 2, 4, 16, 16
    C_out, K = 8, 3
    stride, dilation = (2, 1), (1, 1)

    x = jax.random.normal(k_x, (N, C_in, H, W), jnp.float32)

    fan_in = C_in * K * K
    bound = 1.0 / (fan_in ** 0.5)
    w = jax.random.uniform(k_w, (C_out, C_in, K, K), jnp.float32, -bound, bound)
    b = jax.random.uniform(k_b, (C_out,), jnp.float32, -bound, bound)
    gamma = 1.0 + 0.1 * jax.random.normal(k_g, (C_out,), jnp.float32)
    beta = 0.1 * jax.random.normal(k_be, (C_out,), jnp.float32)

    out = conv2d_block_forward(x, w, b, gamma, beta,
                               stride=stride, dilation=dilation)
    out = jax.block_until_ready(out)

    ref = _reference(x, w, b, gamma, beta, stride, dilation)
    assert out.shape == ref.shape == (N, C_out, H // stride[0], W // stride[1])
    assert jnp.allclose(out, ref, atol=1e-4, rtol=1e-4), \
        float(jnp.max(jnp.abs(out - ref)))

    print("KERNEL_OK")
</pallas_src>

<mosaic_0001>
module attributes {stable_mosaic.version = 11 : i64} {
  func.func @_conv_relu_stats_kernel(%arg0: i32, %arg1: i32, %arg2: memref<8x36xf32, #tpu.memory_space<vmem>>, %arg3: memref<8x1xf32, #tpu.memory_space<vmem>>, %arg4: memref<1x36x128xf32, #tpu.memory_space<vmem>>, %arg5: memref<1x8x128xf32, #tpu.memory_space<vmem>>, %arg6: memref<1x8x1xf32, #tpu.memory_space<vmem>>, %arg7: memref<1x8x1xf32, #tpu.memory_space<vmem>>) attributes {dimension_semantics = [#tpu.dimension_semantics<parallel>, #tpu.dimension_semantics<arbitrary>], iteration_bounds = array<i64: 2, 1>, scalar_prefetch = 0 : i64, scratch_operands = 0 : i64, tpu.core_type = #tpu.core_type<tc>, window_params = [{pipeline_mode = #tpu.pipeline_mode<synchronous>, transform_indices = @transform_0, window_bounds = array<i64: 8, 36>}, {pipeline_mode = #tpu.pipeline_mode<synchronous>, transform_indices = @transform_1, window_bounds = array<i64: 8, 1>}, {transform_indices = @transform_2, window_bounds = array<i64: 1, 36, 128>}, {transform_indices = @transform_3, window_bounds = array<i64: 1, 8, 128>}, {transform_indices = @transform_4, window_bounds = array<i64: 1, 8, 1>}, {transform_indices = @transform_5, window_bounds = array<i64: 1, 8, 1>}]} {
    %c0 = arith.constant 0 : index
    %c0_0 = arith.constant 0 : index
    %0 = vector.load %arg2[%c0, %c0_0] : memref<8x36xf32, #tpu.memory_space<vmem>>, vector<8x36xf32>
    %c0_1 = arith.constant 0 : index
    %c0_2 = arith.constant 0 : index
    %c0_3 = arith.constant 0 : index
    %1 = vector.load %arg4[%c0_1, %c0_2, %c0_3] : memref<1x36x128xf32, #tpu.memory_space<vmem>>, vector<1x36x128xf32>
    %2 = vector.shape_cast %1 : vector<1x36x128xf32> to vector<36x128xf32>
    %cst = arith.constant dense<0.000000e+00> : vector<8x128xf32>
    %3 = tpu.matmul %0, %2, %cst {dimension_numbers = #tpu.dot_dimension_numbers<[1], [0], [0], [1], [0, 0, 1, 1], [], []>} : vector<8x36xf32>, vector<36x128xf32>, vector<8x128xf32> -> vector<8x128xf32>
    %c0_4 = arith.constant 0 : index
    %c0_5 = arith.constant 0 : index
    %4 = vector.load %arg3[%c0_4, %c0_5] : memref<8x1xf32, #tpu.memory_space<vmem>>, vector<8x1xf32>
    %5 = vector.broadcast %4 : vector<8x1xf32> to vector<8x128xf32>
    %6 = arith.addf %3, %5 : vector<8x128xf32>
    %cst_6 = arith.constant 0.000000e+00 : f32
    %7 = vector.broadcast %cst_6 : f32 to vector<8x128xf32>
    %8 = arith.maximumf %6, %7 : vector<8x128xf32>
    %c0_7 = arith.constant 0 : index
    %c0_8 = arith.constant 0 : index
    %c0_9 = arith.constant 0 : index
    %9 = vector.load %arg5[%c0_7, %c0_8, %c0_9] : memref<1x8x128xf32, #tpu.memory_space<vmem>>, vector<1x8x128xf32>
    %10 = vector.shape_cast %9 : vector<1x8x128xf32> to vector<8x128xf32>
    %11 = vector.shape_cast %8 : vector<8x128xf32> to vector<1x8x128xf32>
    tpu.vector_store %arg5[%c0_7, %c0_8, %c0_9], %11 {strides = array<i32>} : memref<1x8x128xf32, #tpu.memory_space<vmem>>, vector<1x8x128xf32>,
    %c0_i32 = arith.constant 0 : i32
    %12 = arith.cmpi eq, %arg1, %c0_i32 : i32
    %13 = arith.extui %12 : i1 to i32
    %c0_i32_10 = arith.constant 0 : i32
    %14 = arith.cmpi ne, %13, %c0_i32_10 : i32
    scf.if %14 {
      %cst_25 = arith.constant 0.000000e+00 : f32
      %32 = vector.broadcast %cst_25 : f32 to vector<8x1xf32>
      %c0_26 = arith.constant 0 : index
      %c0_27 = arith.constant 0 : index
      %c0_28 = arith.constant 0 : index
      %33 = vector.load %arg6[%c0_26, %c0_27, %c0_28] : memref<1x8x1xf32, #tpu.memory_space<vmem>>, vector<1x8x1xf32>
      %34 = vector.shape_cast %33 : vector<1x8x1xf32> to vector<8x1xf32>
      %35 = vector.shape_cast %32 : vector<8x1xf32> to vector<1x8x1xf32>
      tpu.vector_store %arg6[%c0_26, %c0_27, %c0_28], %35 {strides = array<i32>} : memref<1x8x1xf32, #tpu.memory_space<vmem>>, vector<1x8x1xf32>,
      %cst_29 = arith.constant 0.000000e+00 : f32
      %36 = vector.broadcast %cst_29 : f32 to vector<8x1xf32>
      %c0_30 = arith.constant 0 : index
      %c0_31 = arith.constant 0 : index
      %c0_32 = arith.constant 0 : index
      %37 = vector.load %arg7[%c0_30, %c0_31, %c0_32] : memref<1x8x1xf32, #tpu.memory_space<vmem>>, vector<1x8x1xf32>
      %38 = vector.shape_cast %37 : vector<1x8x1xf32> to vector<8x1xf32>
      %39 = vector.shape_cast %36 : vector<8x1xf32> to vector<1x8x1xf32>
      tpu.vector_store %arg7[%c0_30, %c0_31, %c0_32], %39 {strides = array<i32>} : memref<1x8x1xf32, #tpu.memory_space<vmem>>, vector<1x8x1xf32>,
    } else {
    }
    %c0_11 = arith.constant 0 : index
    %c0_12 = arith.constant 0 : index
    %c0_13 = arith.constant 0 : index
    %15 = vector.load %arg6[%c0_11, %c0_12, %c0_13] : memref<1x8x1xf32, #tpu.memory_space<vmem>>, vector<1x8x1xf32>
    %16 = vector.shape_cast %15 : vector<1x8x1xf32> to vector<8x1xf32>
    %cst_14 = arith.constant dense<0.000000e+00> : vector<8xf32>
    %17 = vector.multi_reduction <add>, %8, %cst_14 [1] : vector<8x128xf32> to vector<8xf32>
    %18 = vector.shape_cast %17 : vector<8xf32> to vector<8x1xf32>
    %19 = arith.addf %16, %18 : vector<8x1xf32>
    %c0_15 = arith.constant 0 : index
    %c0_16 = arith.constant 0 : index
    %c0_17 = arith.constant 0 : index
    %20 = vector.load %arg6[%c0_15, %c0_16, %c0_17] : memref<1x8x1xf32, #tpu.memory_space<vmem>>, vector<1x8x1xf32>
    %21 = vector.shape_cast %20 : vector<1x8x1xf32> to vector<8x1xf32>
    %22 = vector.shape_cast %19 : vector<8x1xf32> to vector<1x8x1xf32>
    tpu.vector_store %arg6[%c0_15, %c0_16, %c0_17], %22 {strides = array<i32>} : memref<1x8x1xf32, #tpu.memory_space<vmem>>, vector<1x8x1xf32>,
    %c0_18 = arith.constant 0 : index
    %c0_19 = arith.constant 0 : index
    %c0_20 = arith.constant 0 : index
    %23 = vector.load %arg7[%c0_18, %c0_19, %c0_20] : memref<1x8x1xf32, #tpu.memory_space<vmem>>, vector<1x8x1xf32>
    %24 = vector.shape_cast %23 : vector<1x8x1xf32> to vector<8x1xf32>
    %25 = arith.mulf %8, %8 : vector<8x128xf32>
    %cst_21 = arith.constant dense<0.000000e+00> : vector<8xf32>
    %26 = vector.multi_reduction <add>, %25, %cst_21 [1] : vector<8x128xf32> to vector<8xf32>
    %27 = vector.shape_cast %26 : vector<8xf32> to vector<8x1xf32>
    %28 = arith.addf %24, %27 : vector<8x1xf32>
    %c0_22 = arith.constant 0 : index
    %c0_23 = arith.constant 0 : index
    %c0_24 = arith.constant 0 : index
    %29 = vector.load %arg7[%c0_22, %c0_23, %c0_24] : memref<1x8x1xf32, #tpu.memory_space<vmem>>, vector<1x8x1xf32>
    %30 = vector.shape_cast %29 : vector<1x8x1xf32> to vector<8x1xf32>
    %31 = vector.shape_cast %28 : vector<8x1xf32> to vector<1x8x1xf32>
    tpu.vector_store %arg7[%c0_22, %c0_23, %c0_24], %31 {strides = array<i32>} : memref<1x8x1xf32, #tpu.memory_space<vmem>>, vector<1x8x1xf32>,
    return
  }
  func.func @transform_0(%arg0: i32, %arg1: i32) -> (i32, i32) {
    %c0_i32 = arith.constant 0 : i32
    %c0_i32_0 = arith.constant 0 : i32
    %c0_i32_1 = arith.constant 0 : i32
    return %c0_i32, %c0_i32_0 : i32, i32
  }
  func.func @transform_1(%arg0: i32, %arg1: i32) -> (i32, i32) {
    %c0_i32 = arith.constant 0 : i32
    %c0_i32_0 = arith.constant 0 : i32
    %c0_i32_1 = arith.constant 0 : i32
    return %c0_i32, %c0_i32_0 : i32, i32
  }
  func.func @transform_2(%arg0: i32, %arg1: i32) -> (i32, i32, i32) {
    %c0_i32 = arith.constant 0 : i32
    %c0_i32_0 = arith.constant 0 : i32
    return %arg0, %c0_i32, %arg1 : i32, i32, i32
  }
  func.func @transform_3(%arg0: i32, %arg1: i32) -> (i32, i32, i32) {
    %c0_i32 = arith.constant 0 : i32
    %c0_i32_0 = arith.constant 0 : i32
    return %arg0, %c0_i32, %arg1 : i32, i32, i32
  }
  func.func @transform_4(%arg0: i32, %arg1: i32) -> (i32, i32, i32) {
    %c0_i32 = arith.constant 0 : i32
    %c0_i32_0 = arith.constant 0 : i32
    %c0_i32_1 = arith.constant 0 : i32
    return %arg0, %c0_i32, %c0_i32_0 : i32, i32, i32
  }
  func.func @transform_5(%arg0: i32, %arg1: i32) -> (i32, i32, i32) {
    %c0_i32 = arith.constant 0 : i32
    %c0_i32_0 = arith.constant 0 : i32
    %c0_i32_1 = arith.constant 0 : i32
    return %arg0, %c0_i32, %c0_i32_0 : i32, i32, i32
  }
}

</mosaic_0001>

<bundles_post_ra>
// kernel: tpu_custom_call.1
= control target key start
LH: loop header
LB: loop body
LE: loop exit
PB: predicated region body
PF: predicated region fallthrough
CT: control target
= control target key end

     0   :  { %11 = vsyncpa [#allocation3], 0  ;;  %s866_s0 = inlined_call_operand.vmem [shape: f32[8,36], index: 0, kind: input, shape index: {}]   ;;  %s867_s1 = inlined_call_operand.vmem [shape: f32[8,1], index: 1, kind: input, shape index: {}]   ;;  %s868_s2 = inlined_call_operand.vmem [shape: f32[2,36,128], index: 2, kind: input, shape index: {}]   ;;  %s869_s3 = inlined_call_operand.hbm [shape: f32[2,8,128], index: 3, kind: output, shape index: {0}]   ;;  %s870_s4 = inlined_call_operand.vmem [shape: f32[2,8,1], index: 4, kind: output, shape index: {1}]   ;;  %s871_s5 = inlined_call_operand.vmem [shape: f32[2,8,1], index: 5, kind: output, shape index: {2}]  }
   0x1   :  { %13 = vsyncpa [#allocation3 + $0x1], 0  ;;  %s737_s18 = smov 0   ;;  %s739_s19 = smov 0  }
   0x2   :  { %s741_s20 = smov 0   ;;  %s743_s21 = smov 0  }
   0x3   :  { %s745_s22 = smov 0   ;;  %s747_s23 = smov 0  }
   0x4 LB: > { %s531_s24 = sadd.s32 4294967295, %s701_s23   ;;  %s532_s25 = sadd.s32 4294967294, %s701_s23   ;;  %s701_s23 = sphi %s747_s23, %s19_s23   ;;  %s697_s22 = sphi %s745_s22, %s878_s22   ;;  %s693_s21 = sphi %s743_s21, %s877_s21   ;;  %s689_s20 = sphi %s741_s20, %s876_s20   ;;  %s685_s19 = sphi %s739_s19, %s875_s19   ;;  %s681_s18 = sphi %s737_s18, %s874_s18  }
   0x5   : > { %s31_s26 = sadd.s32 1, %s697_s22  ;;  %s110_s27 = sadd.s32 1, %s689_s20 }
   0x6   : > { %p33_p0 = scmp.ge.s32.totalorder %s31_s26, 2  ;;  %p120_p1 = scmp.ne.s32.totalorder %s689_s20, %s685_s19 }
   0x7   : > { %p121_p2 = scmp.eq.s32.totalorder %s531_s24, 1  ;;  %p126_p3 = scmp.ne.s32.totalorder %s685_s19, %s681_s18 }
   0x8   : > { %s880_s26 = smov (%p33_p0, %s31_s26), 0  ;;  %p127_p5 = scmp.eq.s32.totalorder %s532_s25, 1 }
   0x9   : > { %p777_p4 = por %p121_p2, %p120_p1  ;;  %s105_s29 = ssub.s32 %s697_s22, %s880_s26 }
   0xa   : > { %p535_p6 = scmp.ge.s32.totalorder %s701_s23, 1  ;;  %p108_p7 = scmp.eq.s32.totalorder %s105_s29, 0 }
   0xb   : > { %p784_p8 = por %p127_p5, %p126_p3  ;;  %p214_p9 = scmp.lt.s32.totalorder %s701_s23, 3 }
   0xc   : > { %s790_s6 = scalar_select %p108_p7, %s689_s20, %s110_s27  }
   0xd   : > { %p215_p10 = pnand %p535_p6, %p214_p9 }
   0xe   : > { %p253_p11 = scmp.lt.s32.totalorder (!%p215_p10), %s693_s21, 1  ;;  %s238_s27 = sand.u32 (!%p215_p10), 1, %s685_s19  }
   0xf   : > { %218 = sbr.rel (%p215_p10) target bundleno = 375 (0x177), region = 32  ;;  %s536_s29 = sshll.u32 (!%p215_p10), %s238_s27, 3 }
  0x10   : > { %s240_s7 = scalar_lea.vmem (!%p215_p10), [#allocation2], %s536_s29  ;;  %s543_s11 = sshll.u32 (!%p215_p10), %s693_s21, 7 }
  0x11   : > { %s403_s12 = sshll.u32 (!%p215_p10), %s240_s7, 4  ;;  %s401_s15 = scalar_lea.hbm (!%p215_p10), %s869_s3, %s543_s11  ;;  %s404_s12 = int_to_ptr.vmem [resolvable:$true] %s403_s12 }
  0x12   : > { %s381_s17 = scalar_lea.sflag (!%p215_p10), [#allocation3], %s238_s27  ;;  %s625_s24 = scalar_lea.vmem (!%p215_p10), %s404_s12, 128 }
  0x13   : > { %p626_p12 = scmp.ne.s32.totalorder (!%p215_p10), %s404_s12, %s625_s24  ;;  %s706_s29 = smov (!%p215_p10), [#allocation2]  }
  0x14   : > { %v703_v0 = vmov 0.0   ;;  %vm704_vm0 = vmmov 0   ;;  %v275_v1 = vld [vmem:[%s867_s1] sm:$0xff]  ;;  %s797_s9 = scalar_select %p253_p11, %s693_s21, 1  ;;  %v705_v2 = vmov 0   ;;  %vm285_vm1 = vcmask 1043456  }
  0x15   : > { %552 = vmatprep.subr.mxu0 %v703_v0  ;;  %562 = vmatprep.mubr.msk.f32.mxu0 %vm704_vm0, %v703_v0  ;;  %v269_v8 = vld [vmem:[%s866_s0] sm:$0xff]  ;;  %vm281_vm2 = vcmask 293888   ;;  %vm365_vm3 = vcmask 7168   ;;  %p627_p13 = pnand %p626_p12, %p777_p4  ;;  %s629_s8 = sshll.u32 %s706_s29, 4  ;;  %s630_s8 = int_to_ptr.vmem [resolvable:$false] %s629_s8 }
  0x16   : > { %624 = vset.pattern.permute.xlu0 %v705_v2  ;;  %s565_s10 = smul.u32 40, %s797_s9  ;;  %s538_s16 = sshll.u32 %s797_s9, 3 }
  0x17   : > { %278 = vperm.xlu0 %624, %v275_v1   ;;  %s810_s25 = scalar_lea.vmem %s870_s4, %s538_s16  ;;  %p628_p0 = pneg %p627_p13 }
  0x18   : > { %s260_s13 = scalar_lea.vmem %s868_s2, %s565_s10  ;;  %366 = vst.msk [vmem:[%s810_s25] sm:$0xff] %vm365_vm3, %v703_v0  ;;  %s818_s10 = scalar_lea.vmem %s871_s5, %s538_s16 }
  0x19   : > { %v274_v3 = vld [vmem:[%s260_s13 + $0x20] sm:$0xf]  ;;  %v273_v4 = vld [vmem:[%s260_s13 + $0x18] sm:$0xff]  ;;  %v272_v5 = vld [vmem:[%s260_s13 + $0x10] sm:$0xff]  ;;  %367 = vst.msk [vmem:[%s818_s10] sm:$0xff] %vm365_vm3, %v703_v0  ;;  %s631_s16 = scalar_lea.vmem %s630_s8, 256  ;;  %p632_p1 = scmp.lt.s32.totalorder %s404_s12, %s630_s8 }
  0x1a   : > { %553 = vmatpush3.msk.msra.mxu0 %vm285_vm1, %v274_v3  ;;  %v271_v6 = vld [vmem:[%s260_s13 + $0x8] sm:$0xff]  ;;  %v270_v7 = vld [vmem:[%s260_s13] sm:$0xff]  ;;  %p633_p2 = scmp.lt.s32.totalorder %s631_s16, %s625_s24 }
  0x1b   : > { %554 = vmatprep.subr.mxu0 %v703_v0 }
  0x1c   : > { %555 = vmatpush3.msra.mxu0 %v273_v4  ;;  %p634_p3 = por %p633_p2, %p632_p1 }
  0x1d   : > { %556 = vmatprep.subr.mxu0 %v703_v0 }
  0x1e   : > { %557 = vmatpush3.msra.mxu0 %v272_v5  ;;  %p635_p5 = pnand %p634_p3, %p628_p0 }
  0x1f   : > { %558 = vmatprep.subr.mxu0 %v703_v0 }
  0x20   : > { %559 = vmatpush3.msra.mxu0 %v271_v6 }
  0x21   : > { %560 = vmatprep.subr.mxu0 %v703_v0 }
  0x22   : > { %561 = vmatpush3.msra.mxu0 %v270_v7 }
  0x23   : > { %563 = vmatmul.mubr.msk.f32.vlgmr.msra.gmra.mxu0 %vm281_vm2, %v269_v8 }
  0x92   : > { %v279_v9 = vpop.permute.xlu0 %278 }
  0xe3   : > { %v355_v10 = vpop.f32.mrf.mxu0 }
  0xe4   : > { %v356_v11 = vadd.f32 %v355_v10, %v279_v9 }
  0xe5   : > { %v564_v12 = vpop.f32.mrf.mxu0 }
  0xe6   : > { %v359_v13 = vmax.f32 %v356_v11, 0.0 }
  0xe8   : > { %369 = vadd.xlane.f32.xlu0 %v359_v13  ;;  %v375_v14 = vmul.f32 %v359_v13, %v359_v13  ;;  %360 = vst [vmem:[%s240_s7] sm:$0xff] %v359_v13 }
  0xea   : > { %376 = vadd.xlane.f32.xlu1 %v375_v14 }
  0xeb   : > { %638 = shalt.err (!%p635_p5)
}
  0xec   : > { %s639_s21 = scalar_lea.hbm %s401_s15, 128  ;;  %s643_s9 = scalar_lea.hbm %s869_s3, 256 }
  0xed   : > { %p640_p6 = scmp.ne.s32.totalorder %s401_s15, %s639_s21  ;;  %p644_p10 = scmp.lt.s32.totalorder %s401_s15, %s869_s3 }
  0xee   : > { %p645_p11 = scmp.lt.s32.totalorder %s643_s9, %s639_s21 }
  0xef   : > { %p641_p7 = pnand %p640_p6, %p777_p4 }
  0xf0   : > { %p646_p12 = por %p645_p11, %p644_p10 }
  0xf1   : > { %p642_p9 = pneg %p641_p7 }
  0xf3   : > { %p647_p13 = pnand %p646_p12, %p642_p9 }
  0xf5   : > { %650 = shalt.err (!%p647_p13)
}
  0xf6   : > { %566 = dma.vmem_to_hbm [thread:$0]  (%p777_p4), %s404_s12, 128, %s401_s15, %s381_s17   ;;  %v368_v15 = vld [vmem:[%s810_s25] sm:$0xff] }
  0xf7   : > { %v374_v17 = vld [vmem:[%s818_s10] sm:$0xff] }
 0x171   : > { %v370_v16 = vpop.xlane.xlu0 %369 }
 0x172   : > { %v371_v18 = vadd.f32 %v370_v16, %v368_v15 }
 0x173   : > { %v377_v19 = vpop.xlane.xlu1 %376 }
 0x174   : > { %373 = vst.msk [vmem:[%s810_s25] sm:$0xff] %vm365_vm3, %v371_v18  ;;  %v378_v20 = vadd.f32 %v377_v19, %v374_v17 }
 0x176   : > { %379 = vst.msk [vmem:[%s818_s10] sm:$0xff] %vm365_vm3, %v378_v20 }
 0x177 PF: > { %p572_p0 = scmp.ge.s32.totalorder %s701_s23, 2  ;;  %s421_s28 = sand.u32 1, %s681_s18  }
 0x178   : > { %s422_s12 = scalar_lea.sflag [#allocation3], %s421_s28 }
 0x179   : > { %p569_p1 = pnand %p572_p0, %p784_p8 }
 0x17b   : > { %p570_p2 = pneg %p569_p1 }
 0x17d   : > { %676 = dma.done.wait (%p570_p2), %s422_s12, 128  }
 0x17e   : > { %678 = vsyncadd (%p570_p2), %s422_s12, 4294967168  ;;  %s19_s23 = sadd.s32 1, %s701_s23   ;;  %s874_s18 = smov %s685_s19 }
 0x17f   : > { %p16_p4 = scmp.ge.s32.totalorder %s19_s23, 4   ;;  %s875_s19 = smov %s689_s20 }
 0x180   : > { %s876_s20 = smov %s790_s6  ;;  %s877_s21 = smov %s697_s22 }
 0x181   : > { %s878_s22 = smov %s880_s26  ;;  %18 = sbr.rel (!%p16_p4) target bundleno = 4 (0x4), region = 95 }
 0x186   :  { %441 = vsyncpa [#allocation3], 1 }
 0x187   :  { %443 = vsyncpa [#allocation3 + $0x1], 1 }

</bundles_post_ra>
